<compile_context>
chip_gen: v6e
topology: v6e:2x2x1
jax: 0.10.0
libtpu: 0.0.40
codegen_flags: <defaults>
</compile_context>

<pallas_src>
import functools

import jax
import jax.numpy as jnp
from jax.experimental import pallas as pl
from jax.experimental.pallas import tpu as pltpu


def _round_up(n, m):
    return ((n + m - 1) // m) * m


def _kan_kernel(x_ref, lam_ref, w_ref, b_ref, o_ref, *, precision=None):
    # x_ref:   (bm, input_dim)
    # lam_ref: (input_dim, hidden_dim)   -- pre-transposed lambdas
    # w_ref:   (hidden_dim, out_width)   -- pre-transposed (optionally padded) W_out
    # b_ref:   (1, out_width)            -- (optionally padded) bias
    # o_ref:   (bm, out_width)
    x = x_ref[...]

    # hidden = relu(x @ lambdas.T): [M,K]x[K,N] MXU matmul, f32 accumulation.
    hidden = jnp.dot(x, lam_ref[...],
                     preferred_element_type=jnp.float32, precision=precision)
    hidden = jnp.maximum(hidden, 0.0)

    w = w_ref[...]
    # No-op for f32 weights; deliberate mixed-precision cast on the bf16 path
    # (f32 accumulation preserved via preferred_element_type).
    hidden = hidden.astype(w.dtype)

    out = jnp.dot(hidden, w,
                  preferred_element_type=jnp.float32, precision=precision)
    out = out + b_ref[...].astype(jnp.float32)
    o_ref[...] = out.astype(o_ref.dtype)


def prepare_kan_params(lambdas, w_out, b_out, *, use_bf16=False):
    """One-time parameter preparation (do this at model-build time).

    lambdas: (hidden_dim, input_dim)
    w_out:   (output_dim, hidden_dim)
    b_out:   (output_dim,)
    Returns (lam_t, w_t, b2d, output_dim) ready for kan_forward().
    """
    output_dim = w_out.shape[0]
    lam_t = lambdas.T                      # (input_dim, hidden_dim)
    w_t = w_out.T                          # (hidden_dim, output_dim)
    b2d = b_out.reshape(1, output_dim)

    # Lane-pad the output feature dim only when the pad factor stays <= 2.
    # For tiny output dims (e.g. 16) we write the true width: the masked
    # vst.msk stores are hidden under DMA in this mem-bound kernel, and we
    # avoid 8x output write amplification plus the post-kernel lane slice.
    if output_dim >= 64 and output_dim % 128 != 0:
        out_pad = _round_up(output_dim, 128)
        w_t = jnp.pad(w_t, ((0, 0), (0, out_pad - output_dim)))
        b2d = jnp.pad(b2d, ((0, 0), (0, out_pad - output_dim)))

    if use_bf16:
        lam_t = lam_t.astype(jnp.bfloat16)
        w_t = w_t.astype(jnp.bfloat16)

    return lam_t, w_t, b2d, output_dim


def kan_forward(x, params, *, block_m=1024, use_bf16=False, precision=None):
    """Fused KAN forward pass as a single Pallas kernel, tiled over batch rows.

    x:      (batch, input_dim)
    params: output of prepare_kan_params()
    returns (batch, output_dim)
    """
    lam_t, w_t, b2d, output_dim = params
    batch, input_dim = x.shape
    hidden_dim = lam_t.shape[1]
    out_width = w_t.shape[1]               # possibly lane-padded
    out_dtype = x.dtype

    if use_bf16:
        x = x.astype(jnp.bfloat16)

    # Row tile: as large as possible, but
    #   (a) never larger than the 8-row-rounded batch,
    #   (b) small enough that the parallel grid keeps ~>=4 steps for large
    #       batches (v7x shards the "parallel" axis across its 2 TensorCores),
    #       while staying >= 256 rows so HBM DMAs stay long.
    bm = min(block_m,
             max(256, _round_up(pl.cdiv(batch, 4), 8)),
             _round_up(batch, 8))
    bm = max(8, _round_up(bm, 8))

    # No batch padding: grid = cdiv(batch, bm); Pallas clips the overhanging
    # last block.  OOB input rows only affect OOB output rows, which are
    # discarded on writeback.
    num_steps = pl.cdiv(batch, bm)
    grid = (num_steps,)

    # Deeper pipelining on the streaming x operand for long grids.
    if num_steps >= 3:
        x_spec = pl.BlockSpec((bm, input_dim), lambda i: (i, 0),
                              pipeline_mode=pl.Buffered(3))
    else:
        x_spec = pl.BlockSpec((bm, input_dim), lambda i: (i, 0))

    x_item = jnp.dtype(x.dtype).itemsize
    o_item = jnp.dtype(out_dtype).itemsize
    flops = (2 * batch * input_dim * hidden_dim
             + 2 * batch * hidden_dim * out_width)
    bytes_accessed = (
        batch * input_dim * x_item                                   # x
        + input_dim * hidden_dim * jnp.dtype(lam_t.dtype).itemsize   # lambdas.T
        + hidden_dim * out_width * jnp.dtype(w_t.dtype).itemsize     # W_out.T
        + out_width * jnp.dtype(b2d.dtype).itemsize                  # bias
        + batch * out_width * o_item)                                # output

    out = pl.pallas_call(
        functools.partial(_kan_kernel, precision=precision),
        out_shape=jax.ShapeDtypeStruct((batch, out_width), out_dtype),
        grid_spec=pltpu.PrefetchScalarGridSpec(
            num_scalar_prefetch=0,
            grid=grid,
            in_specs=[
                x_spec,                                                    # x tile (streamed)
                pl.BlockSpec((input_dim, hidden_dim), lambda i: (0, 0)),   # lambdas.T (resident)
                pl.BlockSpec((hidden_dim, out_width), lambda i: (0, 0)),   # W_out.T   (resident)
                pl.BlockSpec((1, out_width), lambda i: (0, 0)),            # bias      (resident)
            ],
            out_specs=pl.BlockSpec((bm, out_width), lambda i: (i, 0)),
        ),
        compiler_params=pltpu.CompilerParams(
            dimension_semantics=("parallel",),
            vmem_limit_bytes=32 * 1024 * 1024,
        ),
        cost_estimate=pl.CostEstimate(
            flops=flops, transcendentals=0, bytes_accessed=bytes_accessed),
    )(x, lam_t, w_t, b2d)

    # Drop lane padding only if it was applied (not the case for small dims).
    if out_width != output_dim:
        out = out[:, :output_dim]
    return out


def kan_reference(x, lambdas, w_out, b_out):
    hidden = jnp.maximum(x @ lambdas.T, 0.0)
    return hidden @ w_out.T + b_out


def _run_case(key, batch, input_dim, hidden_dim, output_dim):
    kx, kl, kw, kb = jax.random.split(key, 4)
    x = jax.random.normal(kx, (batch, input_dim), dtype=jnp.float32)
    lambdas = jax.random.normal(kl, (hidden_dim, input_dim), dtype=jnp.float32)
    w_out = jax.random.normal(kw, (output_dim, hidden_dim), dtype=jnp.float32) * 0.1
    b_out = jax.random.normal(kb, (output_dim,), dtype=jnp.float32) * 0.1

    params = prepare_kan_params(lambdas, w_out, b_out)   # one-time prep
    out = jax.block_until_ready(kan_forward(x, params))

    ref = kan_reference(x, lambdas, w_out, b_out)
    assert out.shape == (batch, output_dim), out.shape
    assert jnp.allclose(out, ref, atol=1e-3, rtol=1e-3), "mismatch vs reference"


if __name__ == "__main__":
    key = jax.random.PRNGKey(0)
    k1, k2 = jax.random.split(key)

    # Case 1: small shapes consistent with the module; batch not divisible by 8
    # and output_dim=16 -> exercises the clipped boundary block and the
    # unpadded (true-width) output path.
    _run_case(k1, batch=133, input_dim=32, hidden_dim=64, output_dim=16)

    # Case 2: multi-step parallel grid (exercises Buffered(3) streaming and the
    # conditional 128-lane output padding path, output_dim=96 -> padded to 128).
    _run_case(k2, batch=1200, input_dim=32, hidden_dim=64, output_dim=96)

    print("KERNEL_OK")
</pallas_src>

<mosaic_0001>
module attributes {stable_mosaic.version = 11 : i64} {
  func.func @_kan_kernel(%arg0: i32, %arg1: memref<136x32xf32, #tpu.memory_space<vmem>>, %arg2: memref<32x64xf32, #tpu.memory_space<vmem>>, %arg3: memref<64x16xf32, #tpu.memory_space<vmem>>, %arg4: memref<1x16xf32, #tpu.memory_space<vmem>>, %arg5: memref<136x16xf32, #tpu.memory_space<vmem>>) attributes {dimension_semantics = [#tpu.dimension_semantics<parallel>], iteration_bounds = array<i64: 1>, scalar_prefetch = 0 : i64, scratch_operands = 0 : i64, tpu.core_type = #tpu.core_type<tc>, window_params = [{transform_indices = @transform_0, window_bounds = array<i64: 136, 32>}, {pipeline_mode = #tpu.pipeline_mode<synchronous>, transform_indices = @transform_1, window_bounds = array<i64: 32, 64>}, {pipeline_mode = #tpu.pipeline_mode<synchronous>, transform_indices = @transform_2, window_bounds = array<i64: 64, 16>}, {pipeline_mode = #tpu.pipeline_mode<synchronous>, transform_indices = @transform_3, window_bounds = array<i64: 1, 16>}, {transform_indices = @transform_4, window_bounds = array<i64: 136, 16>}]} {
    %c0 = arith.constant 0 : index
    %c0_0 = arith.constant 0 : index
    %0 = vector.load %arg1[%c0, %c0_0] : memref<136x32xf32, #tpu.memory_space<vmem>>, vector<136x32xf32>
    %c0_1 = arith.constant 0 : index
    %c0_2 = arith.constant 0 : index
    %1 = vector.load %arg2[%c0_1, %c0_2] : memref<32x64xf32, #tpu.memory_space<vmem>>, vector<32x64xf32>
    %cst = arith.constant dense<0.000000e+00> : vector<136x64xf32>
    %2 = tpu.matmul %0, %1, %cst {dimension_numbers = #tpu.dot_dimension_numbers<[1], [0], [0], [1], [0, 0, 1, 1], [], []>} : vector<136x32xf32>, vector<32x64xf32>, vector<136x64xf32> -> vector<136x64xf32>
    %cst_3 = arith.constant 0.000000e+00 : f32
    %3 = vector.broadcast %cst_3 : f32 to vector<136x64xf32>
    %4 = arith.maximumf %2, %3 : vector<136x64xf32>
    %c0_4 = arith.constant 0 : index
    %c0_5 = arith.constant 0 : index
    %5 = vector.load %arg3[%c0_4, %c0_5] : memref<64x16xf32, #tpu.memory_space<vmem>>, vector<64x16xf32>
    %cst_6 = arith.constant dense<0.000000e+00> : vector<136x16xf32>
    %6 = tpu.matmul %4, %5, %cst_6 {dimension_numbers = #tpu.dot_dimension_numbers<[1], [0], [0], [1], [0, 0, 1, 1], [], []>} : vector<136x64xf32>, vector<64x16xf32>, vector<136x16xf32> -> vector<136x16xf32>
    %c0_7 = arith.constant 0 : index
    %c0_8 = arith.constant 0 : index
    %7 = vector.load %arg4[%c0_7, %c0_8] : memref<1x16xf32, #tpu.memory_space<vmem>>, vector<1x16xf32>
    %8 = vector.broadcast %7 : vector<1x16xf32> to vector<136x16xf32>
    %9 = arith.addf %6, %8 : vector<136x16xf32>
    %c0_9 = arith.constant 0 : index
    %c0_10 = arith.constant 0 : index
    %10 = vector.load %arg5[%c0_9, %c0_10] : memref<136x16xf32, #tpu.memory_space<vmem>>, vector<136x16xf32>
    tpu.vector_store %arg5[%c0_9, %c0_10], %9 {strides = array<i32>} : memref<136x16xf32, #tpu.memory_space<vmem>>, vector<136x16xf32>,
    return
  }
  func.func @transform_0(%arg0: i32) -> (i32, i32) {
    %c0_i32 = arith.constant 0 : i32
    %c0_i32_0 = arith.constant 0 : i32
    return %arg0, %c0_i32 : i32, i32
  }
  func.func @transform_1(%arg0: i32) -> (i32, i32) {
    %c0_i32 = arith.constant 0 : i32
    %c0_i32_0 = arith.constant 0 : i32
    %c0_i32_1 = arith.constant 0 : i32
    return %c0_i32, %c0_i32_0 : i32, i32
  }
  func.func @transform_2(%arg0: i32) -> (i32, i32) {
    %c0_i32 = arith.constant 0 : i32
    %c0_i32_0 = arith.constant 0 : i32
    %c0_i32_1 = arith.constant 0 : i32
    return %c0_i32, %c0_i32_0 : i32, i32
  }
  func.func @transform_3(%arg0: i32) -> (i32, i32) {
    %c0_i32 = arith.constant 0 : i32
    %c0_i32_0 = arith.constant 0 : i32
    %c0_i32_1 = arith.constant 0 : i32
    return %c0_i32, %c0_i32_0 : i32, i32
  }
  func.func @transform_4(%arg0: i32) -> (i32, i32) {
    %c0_i32 = arith.constant 0 : i32
    %c0_i32_0 = arith.constant 0 : i32
    return %arg0, %c0_i32 : i32, i32
  }
}

</mosaic_0001>

<bundles_post_ra>
// kernel: tpu_custom_call.1
= control target key start
LH: loop header
LB: loop body
LE: loop exit
PB: predicated region body
PF: predicated region fallthrough
CT: control target
= control target key end

     0   :  { %v721_v0 = vmov 0.0   ;;  %vm722_vm0 = vmmov 0   ;;  %vm38_vm1 = vcmask 261120   ;;  %vm272_vm2 = vcmask 523264   ;;  %s1047_s1 = inlined_call_operand.vmem [shape: f32[32,64], index: 1, kind: input, shape index: {}]   ;;  %s1048_s0 = inlined_call_operand.vmem [shape: f32[133,32], index: 0, kind: input, shape index: {}]   ;;  %s1049_s2 = inlined_call_operand.vmem [shape: f32[64,16], index: 2, kind: input, shape index: {}]   ;;  %s1050_s3 = inlined_call_operand.vmem [shape: f32[1,16], index: 3, kind: input, shape index: {}]   ;;  %s1051_s4 = inlined_call_operand.vmem [shape: f32[133,16], index: 4, kind: output, shape index: {}]  }
   0x1   :  { %577 = vmatprep.subr.mxu0 %v721_v0  ;;  %v37_v1 = vld [vmem:[%s1047_s1 + $0x18] sm:$0xff]  ;;  %v36_v2 = vld [vmem:[%s1047_s1 + $0x10] sm:$0xff]  ;;  %585 = vmatprep.mubr.msk.f32.mxu0 %vm722_vm0, %v721_v0  ;;  %v35_v3 = vld [vmem:[%s1047_s1 + $0x8] sm:$0xff]  ;;  %vm474_vm3 = vcmask 130048  }
   0x2   :  { %578 = vmatpush3.msra.mxu0 %v37_v1  ;;  %703 = vmatprep.subr.mxu1 %v721_v0  ;;  %v34_v4 = vld [vmem:[%s1047_s1] sm:$0xff]  ;;  %v264_v6 = vld [vmem:[%s1049_s2 + $0x38] sm:$0xff]  ;;  %v263_v7 = vld [vmem:[%s1049_s2 + $0x30] sm:$0xff] }
   0x3   :  { %579 = vmatprep.subr.mxu0 %v721_v0  ;;  %655 = vmatprep.mubr.msk.f32.mxu1 %vm722_vm0, %v721_v0  ;;  %v17_v5 = vld [vmem:[%s1048_s0] sm:$0xff]  ;;  %v18_v8 = vld [vmem:[%s1048_s0 + $0x8] sm:$0xff]  ;;  %v19_v11 = vld [vmem:[%s1048_s0 + $0x10] sm:$0xff] }
   0x4   :  { %580 = vmatpush3.msra.mxu0 %v36_v2  ;;  %711 = vmatpush3.msra.mxu1 %v264_v6  ;;  %v262_v9 = vld [vmem:[%s1049_s2 + $0x28] sm:$0xff]  ;;  %v261_v10 = vld [vmem:[%s1049_s2 + $0x20] sm:$0xff]  ;;  %v260_v12 = vld [vmem:[%s1049_s2 + $0x18] sm:$0xff] }
   0x5   :  { %581 = vmatprep.subr.mxu0 %v721_v0  ;;  %704 = vmatprep.subr.mxu1 %v721_v0  ;;  %v20_v13 = vld [vmem:[%s1048_s0 + $0x18] sm:$0xff]  ;;  %v259_v14 = vld [vmem:[%s1049_s2 + $0x10] sm:$0xff]  ;;  %v21_v15 = vld [vmem:[%s1048_s0 + $0x20] sm:$0xff] }
   0x6   :  { %582 = vmatpush3.msra.mxu0 %v35_v3  ;;  %712 = vmatpush3.msra.mxu1 %v263_v7  ;;  %v22_v16 = vld [vmem:[%s1048_s0 + $0x28] sm:$0xff]  ;;  %v23_v17 = vld [vmem:[%s1048_s0 + $0x30] sm:$0xff]  ;;  %v24_v18 = vld [vmem:[%s1048_s0 + $0x38] sm:$0xff] }
   0x7   :  { %583 = vmatprep.subr.mxu0 %v721_v0  ;;  %705 = vmatprep.subr.mxu1 %v721_v0  ;;  %v25_v19 = vld [vmem:[%s1048_s0 + $0x40] sm:$0xff]  ;;  %v26_v20 = vld [vmem:[%s1048_s0 + $0x48] sm:$0xff]  ;;  %v27_v21 = vld [vmem:[%s1048_s0 + $0x50] sm:$0xff] }
   0x8   :  { %584 = vmatpush3.msra.mxu0 %v34_v4  ;;  %713 = vmatpush3.msra.mxu1 %v262_v9  ;;  %v28_v22 = vld [vmem:[%s1048_s0 + $0x58] sm:$0xff]  ;;  %v29_v23 = vld [vmem:[%s1048_s0 + $0x60] sm:$0xff]  ;;  %v30_v24 = vld [vmem:[%s1048_s0 + $0x68] sm:$0xff] }
   0x9   :  { %586 = vmatmul.mubr.msk.f32.vlgmr.msra.gmra.mxu0 %vm38_vm1, %v17_v5  ;;  %636 = vmatprep.subr.mxu0 %v721_v0  ;;  %v31_v25 = vld [vmem:[%s1048_s0 + $0x70] sm:$0xff]  ;;  %v32_v26 = vld [vmem:[%s1048_s0 + $0x78] sm:$0xff]  ;;  %v33_v27 = vld [vmem:[%s1048_s0 + $0x80] sm:$0xff] }
   0xa   :  { %588 = vmatprep.mubr.msk.f32.mxu0 %vm722_vm0, %v721_v0  ;;  %637 = vmatpush3.msra.mxu0 %v264_v6  ;;  %v258_v28 = vld [vmem:[%s1049_s2 + $0x8] sm:$0xff]  ;;  %v257_v29 = vld [vmem:[%s1049_s2] sm:$0xff] }
   0xb   :  { %638 = vmatprep.subr.mxu0 %v721_v0  ;;  %706 = vmatprep.subr.mxu1 %v721_v0 }
   0xc   :  { %639 = vmatpush3.msra.mxu0 %v263_v7  ;;  %714 = vmatpush3.msra.mxu1 %v261_v10 }
   0xd   :  { %589 = vmatmul.mubr.msk.f32.gmra.mxu0 %vm38_vm1, %v18_v8  ;;  %640 = vmatprep.subr.mxu0 %v721_v0 }
   0xe   :  { %591 = vmatprep.mubr.msk.f32.mxu0 %vm722_vm0, %v721_v0  ;;  %641 = vmatpush3.msra.mxu0 %v262_v9 }
   0xf   :  { %642 = vmatprep.subr.mxu0 %v721_v0  ;;  %707 = vmatprep.subr.mxu1 %v721_v0 }
  0x10   :  { %643 = vmatpush3.msra.mxu0 %v261_v10  ;;  %715 = vmatpush3.msra.mxu1 %v260_v12 }
  0x11   :  { %592 = vmatmul.mubr.msk.f32.gmra.mxu0 %vm38_vm1, %v19_v11  ;;  %644 = vmatprep.subr.mxu0 %v721_v0 }
  0x12   :  { %594 = vmatprep.mubr.msk.f32.mxu0 %vm722_vm0, %v721_v0  ;;  %645 = vmatpush3.msra.mxu0 %v260_v12 }
  0x13   :  { %646 = vmatprep.subr.mxu0 %v721_v0  ;;  %708 = vmatprep.subr.mxu1 %v721_v0 }
  0x14   :  { %647 = vmatpush3.msra.mxu0 %v259_v14  ;;  %716 = vmatpush3.msra.mxu1 %v259_v14 }
  0x15   :  { %595 = vmatmul.mubr.msk.f32.gmra.mxu0 %vm38_vm1, %v20_v13  ;;  %648 = vmatprep.subr.mxu0 %v721_v0 }
  0x16   :  { %597 = vmatprep.mubr.msk.f32.mxu0 %vm722_vm0, %v721_v0  ;;  %709 = vmatprep.subr.mxu1 %v721_v0 }
  0x17   :  { %717 = vmatpush3.msra.mxu1 %v258_v28  ;;  %649 = vmatpush3.msra.mxu0 %v258_v28 }
  0x18   :  { %650 = vmatprep.subr.mxu0 %v721_v0  ;;  %710 = vmatprep.subr.mxu1 %v721_v0 }
  0x19   :  { %598 = vmatmul.mubr.msk.f32.gmra.mxu0 %vm38_vm1, %v21_v15  ;;  %718 = vmatpush3.msra.mxu1 %v257_v29 }
  0x1a   :  { %600 = vmatprep.mubr.msk.f32.mxu0 %vm722_vm0, %v721_v0  ;;  %651 = vmatpush3.msra.mxu0 %v257_v29 }
  0x1d   :  { %601 = vmatmul.mubr.msk.f32.gmra.mxu0 %vm38_vm1, %v22_v16 }
  0x1e   :  { %603 = vmatprep.mubr.msk.f32.mxu0 %vm722_vm0, %v721_v0 }
  0x21   :  { %604 = vmatmul.mubr.msk.f32.gmra.mxu0 %vm38_vm1, %v23_v17 }
  0x22   :  { %606 = vmatprep.mubr.msk.f32.mxu0 %vm722_vm0, %v721_v0 }
  0x25   :  { %607 = vmatmul.mubr.msk.f32.gmra.mxu0 %vm38_vm1, %v24_v18  ;;  %v960_v18 = vld [vmem:[%s1050_s3] ss:$0 sm:$0xff] }
  0x26   :  { %609 = vmatprep.mubr.msk.f32.mxu0 %vm722_vm0, %v721_v0 }
  0x29   :  { %610 = vmatmul.mubr.msk.f32.gmra.mxu0 %vm38_vm1, %v25_v19 }
  0x2a   :  { %612 = vmatprep.mubr.msk.f32.mxu0 %vm722_vm0, %v721_v0 }
  0x2d   :  { %613 = vmatmul.mubr.msk.f32.gmra.mxu0 %vm38_vm1, %v26_v20 }
  0x2e   :  { %615 = vmatprep.mubr.msk.f32.mxu0 %vm722_vm0, %v721_v0 }
  0x31   :  { %616 = vmatmul.mubr.msk.f32.gmra.mxu0 %vm38_vm1, %v27_v21 }
  0x32   :  { %618 = vmatprep.mubr.msk.f32.mxu0 %vm722_vm0, %v721_v0 }
  0x35   :  { %619 = vmatmul.mubr.msk.f32.gmra.mxu0 %vm38_vm1, %v28_v22 }
  0x36   :  { %621 = vmatprep.mubr.msk.f32.mxu0 %vm722_vm0, %v721_v0 }
  0x39   :  { %622 = vmatmul.mubr.msk.f32.gmra.mxu0 %vm38_vm1, %v29_v23 }
  0x3a   :  { %624 = vmatprep.mubr.msk.f32.mxu0 %vm722_vm0, %v721_v0 }
  0x3d   :  { %625 = vmatmul.mubr.msk.f32.gmra.mxu0 %vm38_vm1, %v30_v24 }
  0x3e   :  { %627 = vmatprep.mubr.msk.f32.mxu0 %vm722_vm0, %v721_v0 }
  0x41   :  { %628 = vmatmul.mubr.msk.f32.gmra.mxu0 %vm38_vm1, %v31_v25 }
  0x42   :  { %630 = vmatprep.mubr.msk.f32.mxu0 %vm722_vm0, %v721_v0 }
  0x45   :  { %631 = vmatmul.mubr.msk.f32.gmra.mxu0 %vm38_vm1, %v32_v26 }
  0x46   :  { %633 = vmatprep.mubr.msk.f32.mxu0 %vm722_vm0, %v721_v0 }
  0x49   :  { %634 = vmatmul.mubr.msk.f32.gmra.mxu0 %vm38_vm1, %v33_v27 }
  0x4a   :  { %652 = vmatprep.mubr.msk.f32.mxu0 %vm722_vm0, %v721_v0 }
  0xc9   :  { %v156_v30 = vpop.f32.mrf.mxu0 }
  0xca   :  { %v240_v31 = vmax.f32 %v156_v30, 0.0 }
  0xcb   :  { %v587_v32 = vpop.f32.mrf.mxu0 }
  0xcc   :  { %653 = vmatmul.mubr.msk.f32.vlgmr.msra.gmra.mxu0 %vm272_vm2, %v240_v31 }
  0xcd   :  { %v161_v33 = vpop.f32.mrf.mxu0 }
  0xce   :  { %v241_v34 = vmax.f32 %v161_v33, 0.0 }
  0xcf   :  { %v590_v35 = vpop.f32.mrf.mxu0 }
  0xd0   :  { %656 = vmatmul.mubr.msk.f32.vlgmr.msra.gmra.mxu1 %vm272_vm2, %v241_v34 }
  0xd1   :  { %v166_v36 = vpop.f32.mrf.mxu0  ;;  %658 = vmatprep.mubr.msk.f32.mxu1 %vm722_vm0, %v721_v0 }
  0xd2   :  { %v242_v37 = vmax.f32 %v166_v36, 0.0 }
  0xd3   :  { %v593_v38 = vpop.f32.mrf.mxu0 }
  0xd4   :  { %659 = vmatmul.mubr.msk.f32.gmra.mxu1 %vm272_vm2, %v242_v37 }
  0xd5   :  { %v171_v39 = vpop.f32.mrf.mxu0  ;;  %661 = vmatprep.mubr.msk.f32.mxu1 %vm722_vm0, %v721_v0 }
  0xd6   :  { %v243_v40 = vmax.f32 %v171_v39, 0.0 }
  0xd7   :  { %v596_v41 = vpop.f32.mrf.mxu0 }
  0xd8   :  { %662 = vmatmul.mubr.msk.f32.gmra.mxu1 %vm272_vm2, %v243_v40 }
  0xd9   :  { %v176_v42 = vpop.f32.mrf.mxu0  ;;  %664 = vmatprep.mubr.msk.f32.mxu1 %vm722_vm0, %v721_v0 }
  0xda   :  { %v244_v43 = vmax.f32 %v176_v42, 0.0 }
  0xdb   :  { %v599_v44 = vpop.f32.mrf.mxu0 }
  0xdc   :  { %665 = vmatmul.mubr.msk.f32.gmra.mxu1 %vm272_vm2, %v244_v43 }
  0xdd   :  { %v181_v45 = vpop.f32.mrf.mxu0  ;;  %667 = vmatprep.mubr.msk.f32.mxu1 %vm722_vm0, %v721_v0 }
  0xde   :  { %v245_v46 = vmax.f32 %v181_v45, 0.0 }
  0xdf   :  { %v602_v47 = vpop.f32.mrf.mxu0 }
  0xe0   :  { %668 = vmatmul.mubr.msk.f32.gmra.mxu1 %vm272_vm2, %v245_v46 }
  0xe1   :  { %v186_v48 = vpop.f32.mrf.mxu0  ;;  %670 = vmatprep.mubr.msk.f32.mxu1 %vm722_vm0, %v721_v0 }
  0xe2   :  { %v246_v49 = vmax.f32 %v186_v48, 0.0 }
  0xe3   :  { %v605_v50 = vpop.f32.mrf.mxu0 }
  0xe4   :  { %671 = vmatmul.mubr.msk.f32.gmra.mxu1 %vm272_vm2, %v246_v49 }
  0xe5   :  { %v191_v51 = vpop.f32.mrf.mxu0  ;;  %673 = vmatprep.mubr.msk.f32.mxu1 %vm722_vm0, %v721_v0 }
  0xe6   :  { %v247_v52 = vmax.f32 %v191_v51, 0.0 }
  0xe7   :  { %v608_v53 = vpop.f32.mrf.mxu0 }
  0xe8   :  { %674 = vmatmul.mubr.msk.f32.gmra.mxu1 %vm272_vm2, %v247_v52 }
  0xe9   :  { %v196_v54 = vpop.f32.mrf.mxu0  ;;  %676 = vmatprep.mubr.msk.f32.mxu1 %vm722_vm0, %v721_v0 }
  0xea   :  { %v248_v55 = vmax.f32 %v196_v54, 0.0 }
  0xeb   :  { %v611_v56 = vpop.f32.mrf.mxu0 }
  0xec   :  { %677 = vmatmul.mubr.msk.f32.gmra.mxu1 %vm272_vm2, %v248_v55 }
  0xed   :  { %v201_v57 = vpop.f32.mrf.mxu0  ;;  %679 = vmatprep.mubr.msk.f32.mxu1 %vm722_vm0, %v721_v0 }
  0xee   :  { %v249_v58 = vmax.f32 %v201_v57, 0.0 }
  0xef   :  { %v614_v59 = vpop.f32.mrf.mxu0 }
  0xf0   :  { %680 = vmatmul.mubr.msk.f32.gmra.mxu1 %vm272_vm2, %v249_v58 }
  0xf1   :  { %v206_v60 = vpop.f32.mrf.mxu0  ;;  %682 = vmatprep.mubr.msk.f32.mxu1 %vm722_vm0, %v721_v0 }
  0xf2   :  { %v250_v61 = vmax.f32 %v206_v60, 0.0 }
  0xf3   :  { %v617_v62 = vpop.f32.mrf.mxu0 }
  0xf4   :  { %683 = vmatmul.mubr.msk.f32.gmra.mxu1 %vm272_vm2, %v250_v61 }
  0xf5   :  { %v211_v63 = vpop.f32.mrf.mxu0  ;;  %685 = vmatprep.mubr.msk.f32.mxu1 %vm722_vm0, %v721_v0 }
  0xf6   :  { %v251_v1 = vmax.f32 %v211_v63, 0.0 }
  0xf7   :  { %v620_v2 = vpop.f32.mrf.mxu0 }
  0xf8   :  { %686 = vmatmul.mubr.msk.f32.gmra.mxu1 %vm272_vm2, %v251_v1 }
  0xf9   :  { %v216_v3 = vpop.f32.mrf.mxu0  ;;  %688 = vmatprep.mubr.msk.f32.mxu1 %vm722_vm0, %v721_v0 }
  0xfa   :  { %v252_v4 = vmax.f32 %v216_v3, 0.0 }
  0xfb   :  { %v623_v5 = vpop.f32.mrf.mxu0 }
  0xfc   :  { %689 = vmatmul.mubr.msk.f32.gmra.mxu1 %vm272_vm2, %v252_v4 }
  0xfd   :  { %v221_v6 = vpop.f32.mrf.mxu0  ;;  %691 = vmatprep.mubr.msk.f32.mxu1 %vm722_vm0, %v721_v0 }
  0xfe   :  { %v253_v7 = vmax.f32 %v221_v6, 0.0 }
  0xff   :  { %v626_v8 = vpop.f32.mrf.mxu0 }
 0x100   :  { %692 = vmatmul.mubr.msk.f32.gmra.mxu1 %vm272_vm2, %v253_v7 }
 0x101   :  { %v226_v9 = vpop.f32.mrf.mxu0  ;;  %694 = vmatprep.mubr.msk.f32.mxu1 %vm722_vm0, %v721_v0 }
 0x102   :  { %v254_v10 = vmax.f32 %v226_v9, 0.0 }
 0x103   :  { %v629_v11 = vpop.f32.mrf.mxu0 }
 0x104   :  { %695 = vmatmul.mubr.msk.f32.gmra.mxu1 %vm272_vm2, %v254_v10 }
 0x105   :  { %v231_v12 = vpop.f32.mrf.mxu0  ;;  %697 = vmatprep.mubr.msk.f32.mxu1 %vm722_vm0, %v721_v0 }
 0x106   :  { %v255_v13 = vmax.f32 %v231_v12, 0.0 }
 0x107   :  { %v632_v14 = vpop.f32.mrf.mxu0 }
 0x108   :  { %698 = vmatmul.mubr.msk.f32.gmra.mxu1 %vm272_vm2, %v255_v13 }
 0x109   :  { %v236_v15 = vpop.f32.mrf.mxu0  ;;  %700 = vmatprep.mubr.msk.f32.mxu1 %vm722_vm0, %v721_v0 }
 0x10a   :  { %v256_v16 = vmax.f32 %v236_v15, 0.0 }
 0x10b   :  { %v635_v17 = vpop.f32.mrf.mxu0 }
 0x10c   :  { %701 = vmatmul.mubr.msk.f32.gmra.mxu1 %vm272_vm2, %v256_v16 }
 0x18c   :  { %v390_v19 = vpop.f32.mrf.mxu0 }
 0x18d   :  { %v391_v20 = vadd.f32 %v960_v18, %v390_v19 }
 0x18e   :  { %v654_v21 = vpop.f32.mrf.mxu0 }
 0x18f   :  { %475 = vst.msk [vmem:[%s1051_s4] sm:$0xff] %vm474_vm3, %v391_v20 }
 0x190   :  { %v395_v0 = vpop.f32.mrf.mxu1 }
 0x191   :  { %v396_v22 = vadd.f32 %v960_v18, %v395_v0 }
 0x192   :  { %v657_v23 = vpop.f32.mrf.mxu1 }
 0x193   :  { %476 = vst.msk [vmem:[%s1051_s4 + $0x8] sm:$0xff] %vm474_vm3, %v396_v22 }
 0x194   :  { %v400_v24 = vpop.f32.mrf.mxu1 }
 0x195   :  { %v401_v25 = vadd.f32 %v960_v18, %v400_v24 }
 0x196   :  { %v660_v26 = vpop.f32.mrf.mxu1 }
 0x197   :  { %477 = vst.msk [vmem:[%s1051_s4 + $0x10] sm:$0xff] %vm474_vm3, %v401_v25 }
 0x198   :  { %v405_v27 = vpop.f32.mrf.mxu1 }
 0x199   :  { %v406_v28 = vadd.f32 %v960_v18, %v405_v27 }
 0x19a   :  { %v663_v29 = vpop.f32.mrf.mxu1 }
 0x19b   :  { %478 = vst.msk [vmem:[%s1051_s4 + $0x18] sm:$0xff] %vm474_vm3, %v406_v28 }
 0x19c   :  { %v410_v30 = vpop.f32.mrf.mxu1 }
 0x19d   :  { %v411_v31 = vadd.f32 %v960_v18, %v410_v30 }
 0x19e   :  { %v666_v32 = vpop.f32.mrf.mxu1 }
 0x19f   :  { %479 = vst.msk [vmem:[%s1051_s4 + $0x20] sm:$0xff] %vm474_vm3, %v411_v31 }
 0x1a0   :  { %v415_v33 = vpop.f32.mrf.mxu1 }
 0x1a1   :  { %v416_v34 = vadd.f32 %v960_v18, %v415_v33 }
 0x1a2   :  { %v669_v35 = vpop.f32.mrf.mxu1 }
 0x1a3   :  { %480 = vst.msk [vmem:[%s1051_s4 + $0x28] sm:$0xff] %vm474_vm3, %v416_v34 }
 0x1a4   :  { %v420_v36 = vpop.f32.mrf.mxu1 }
 0x1a5   :  { %v421_v37 = vadd.f32 %v960_v18, %v420_v36 }
 0x1a6   :  { %v672_v38 = vpop.f32.mrf.mxu1 }
 0x1a7   :  { %481 = vst.msk [vmem:[%s1051_s4 + $0x30] sm:$0xff] %vm474_vm3, %v421_v37 }
 0x1a8   :  { %v425_v39 = vpop.f32.mrf.mxu1 }
 0x1a9   :  { %v426_v40 = vadd.f32 %v960_v18, %v425_v39 }
 0x1aa   :  { %v675_v41 = vpop.f32.mrf.mxu1 }
 0x1ab   :  { %482 = vst.msk [vmem:[%s1051_s4 + $0x38] sm:$0xff] %vm474_vm3, %v426_v40 }
 0x1ac   :  { %v430_v42 = vpop.f32.mrf.mxu1 }
 0x1ad   :  { %v431_v43 = vadd.f32 %v960_v18, %v430_v42 }
 0x1ae   :  { %v678_v44 = vpop.f32.mrf.mxu1 }
 0x1af   :  { %483 = vst.msk [vmem:[%s1051_s4 + $0x40] sm:$0xff] %vm474_vm3, %v431_v43 }
 0x1b0   :  { %v435_v45 = vpop.f32.mrf.mxu1 }
 0x1b1   :  { %v436_v46 = vadd.f32 %v960_v18, %v435_v45 }
 0x1b2   :  { %v681_v47 = vpop.f32.mrf.mxu1 }
 0x1b3   :  { %484 = vst.msk [vmem:[%s1051_s4 + $0x48] sm:$0xff] %vm474_vm3, %v436_v46 }
 0x1b4   :  { %v440_v48 = vpop.f32.mrf.mxu1 }
 0x1b5   :  { %v441_v49 = vadd.f32 %v960_v18, %v440_v48 }
 0x1b6   :  { %v684_v50 = vpop.f32.mrf.mxu1 }
 0x1b7   :  { %485 = vst.msk [vmem:[%s1051_s4 + $0x50] sm:$0xff] %vm474_vm3, %v441_v49 }
 0x1b8   :  { %v445_v51 = vpop.f32.mrf.mxu1 }
 0x1b9   :  { %v446_v52 = vadd.f32 %v960_v18, %v445_v51 }
 0x1ba   :  { %v687_v53 = vpop.f32.mrf.mxu1 }
 0x1bb   :  { %486 = vst.msk [vmem:[%s1051_s4 + $0x58] sm:$0xff] %vm474_vm3, %v446_v52 }
 0x1bc   :  { %v450_v54 = vpop.f32.mrf.mxu1 }
 0x1bd   :  { %v451_v55 = vadd.f32 %v960_v18, %v450_v54 }
 0x1be   :  { %v690_v56 = vpop.f32.mrf.mxu1 }
 0x1bf   :  { %487 = vst.msk [vmem:[%s1051_s4 + $0x60] sm:$0xff] %vm474_vm3, %v451_v55 }
 0x1c0   :  { %v455_v57 = vpop.f32.mrf.mxu1 }
 0x1c1   :  { %v456_v58 = vadd.f32 %v960_v18, %v455_v57 }
 0x1c2   :  { %v693_v59 = vpop.f32.mrf.mxu1 }
 0x1c3   :  { %488 = vst.msk [vmem:[%s1051_s4 + $0x68] sm:$0xff] %vm474_vm3, %v456_v58 }
 0x1c4   :  { %v460_v60 = vpop.f32.mrf.mxu1 }
 0x1c5   :  { %v461_v61 = vadd.f32 %v960_v18, %v460_v60 }
 0x1c6   :  { %v696_v62 = vpop.f32.mrf.mxu1 }
 0x1c7   :  { %489 = vst.msk [vmem:[%s1051_s4 + $0x70] sm:$0xff] %vm474_vm3, %v461_v61 }
 0x1c8   :  { %v465_v63 = vpop.f32.mrf.mxu1 }
 0x1c9   :  { %v466_v1 = vadd.f32 %v960_v18, %v465_v63 }
 0x1ca   :  { %v699_v2 = vpop.f32.mrf.mxu1 }
 0x1cb   :  { %490 = vst.msk [vmem:[%s1051_s4 + $0x78] sm:$0xff] %vm474_vm3, %v466_v1 }
 0x1cc   :  { %v470_v3 = vpop.f32.mrf.mxu1 }
 0x1cd   :  { %v471_v4 = vadd.f32 %v960_v18, %v470_v3 }
 0x1ce   :  { %v702_v5 = vpop.f32.mrf.mxu1 }
 0x1cf   :  { %491 = vst.msk [vmem:[%s1051_s4 + $0x80] sm:$0xff] %vm474_vm3, %v471_v4 }

</bundles_post_ra>
